<compile_context>
chip_gen: v7x
topology: tpu7x:2x2x1
jax: 0.10.0
libtpu: 0.0.40
codegen_flags: <defaults>
</compile_context>

<pallas_src>
import functools

import numpy as np

import jax
import jax.numpy as jnp
from jax import lax
from jax.experimental import pallas as pl
from jax.experimental.pallas import tpu as pltpu


def _conv_bn_lrelu_kernel(x_ref, t_ref, shift_ref, out_ref, xs_ref, *,
                          B, H, H_out, KH, pad):
    # x_ref:     (B*H,      W*Cin)        bf16  batch tile of NHWC rows (W,C fused in lanes)
    # t_ref:     (KH, W*Cin, Wout*Cout)   bf16  block-Toeplitz weights, BN scale folded in
    # shift_ref: (1, Wout*Cout)           f32   BN shift tiled over W_out
    # out_ref:   (B*H_out,  Wout*Cout)    bf16  lane-dense output slab
    # xs_ref:    (KH, B*H_out, W*Cin)     bf16  aligned per-tap LHS slabs (scratch)
    w_cin = x_ref.shape[1]

    # Build the per-tap LHS slabs: slab kh, image b, row r holds image row
    # (r + kh - pad), or zeros when that row falls in the padding halo.
    # All slices are static; only halo rows are zeroed (no full memset).
    for kh in range(KH):
        dst_lo = max(0, pad - kh)
        dst_hi = min(H_out, H + pad - kh)
        for b in range(B):
            base = b * H_out
            if dst_lo > 0:
                xs_ref[kh, base:base + dst_lo, :] = jnp.zeros(
                    (dst_lo, w_cin), x_ref.dtype)
            if dst_hi < H_out:
                xs_ref[kh, base + dst_hi:base + H_out, :] = jnp.zeros(
                    (H_out - dst_hi, w_cin), x_ref.dtype)
            if dst_hi > dst_lo:
                src_lo = dst_lo + kh - pad
                src_hi = dst_hi + kh - pad
                xs_ref[kh, base + dst_lo:base + dst_hi, :] = (
                    x_ref[b * H + src_lo:b * H + src_hi, :])

    # KH accumulated MXU matmuls: M = B*H_out, K = W*Cin, N = W_out*Cout.
    # LHS slabs are read at leading-dim indices (sublane/lane aligned), bf16
    # operands, f32 accumulation; the result is already in the lane-dense
    # store layout (no activation im2col / shuffles).
    acc = jnp.dot(xs_ref[0], t_ref[0], preferred_element_type=jnp.float32)
    for kh in range(1, KH):  # static unroll, KH is small (e.g. 3)
        acc = acc + jnp.dot(xs_ref[kh], t_ref[kh],
                            preferred_element_type=jnp.float32)

    # BN scale is folded into T; epilogue = shift add + LeakyReLU(0.1) on VPU.
    y = acc + shift_ref[...]
    y = jnp.where(y > 0, y, 0.1 * y)
    out_ref[...] = y.astype(out_ref.dtype)


def _pick_batch_tile(n, h, h_out, max_m=256):
    """Largest divisor B of n with B*h_out <= max_m (f32 acc stays in vregs)
    and sublane-friendly block heights (multiples of 8, or the full batch)."""
    best = 1
    for b in range(1, n + 1):
        if n % b:
            continue
        if b * h_out > max_m:
            break
        if b == n or (b * h % 8 == 0 and b * h_out % 8 == 0):
            best = b
    return best


@functools.partial(jax.jit, static_argnames=("padding",))
def conv_block_forward(x_nchw, weight_oihw, gamma, beta, running_mean,
                       running_var, *, padding, eps=1e-5):
    """ConvBlock forward. x: (N, Cin, H, W) -> (N, Cout, H_out, W_out) (bf16)."""
    N, Cin, H, W = x_nchw.shape
    Cout, Cin_w, KH, KW = weight_oihw.shape
    p = int(padding)
    # The fused kernel hard-codes Conv2d(stride=1, dilation=1, groups=1,
    # bias=False, symmetric int padding) + eval-mode BatchNorm, as in ConvBlock.
    assert Cin_w == Cin, "grouped conv not supported"
    assert p >= 0
    H_out = H + 2 * p - KH + 1
    W_out = W + 2 * p - KW + 1
    assert H_out > 0 and W_out > 0

    # ---- glue: layout + parameter folding only (no activation compute) ----
    # NCHW -> (N*H, W*Cin) lane-dense row slab, bf16 for the MXU.
    x_rows = jnp.transpose(x_nchw, (0, 2, 3, 1)).astype(jnp.bfloat16)
    x_rows = x_rows.reshape(N * H, W * Cin)

    # Inference BatchNorm folded to per-channel scale/shift; scale is folded
    # into the weights (in f32, before the bf16 cast), shift stays in epilogue.
    scale = gamma / jnp.sqrt(running_var + eps)
    shift = (beta - running_mean * scale).astype(jnp.float32)
    shift_row = jnp.tile(shift, W_out).reshape(1, W_out * Cout)

    # Block-Toeplitz weights over in-image W taps only (K = W*Cin):
    #   T[kh, iw*Cin+ci, w*Cout+co] = weight[co, ci, kh, iw-w+p] * scale[co]
    # built with a single vectorized gather using a static numpy index map.
    w_taps = jnp.transpose(weight_oihw, (2, 3, 1, 0))            # (KH,KW,Cin,Cout)
    w_taps = w_taps * scale[None, None, None, :]                 # fold BN scale (f32)
    iw = np.arange(W)[:, None]
    wo = np.arange(W_out)[None, :]
    kw_idx = iw - wo + p                                         # (W, W_out)
    valid = ((kw_idx >= 0) & (kw_idx < KW)).astype(np.float32)
    kw_idx = np.clip(kw_idx, 0, KW - 1)
    t = w_taps[:, kw_idx, :, :]                                  # (KH,W,W_out,Cin,Cout)
    t = t * valid[None, :, :, None, None]
    t = jnp.transpose(t, (0, 1, 3, 2, 4))                        # (KH,W,Cin,W_out,Cout)
    t = t.reshape(KH, W * Cin, W_out * Cout).astype(jnp.bfloat16)

    # Batch tile: MXU M = B*H_out rows per grid step, accumulator <= 256 rows.
    B = _pick_batch_tile(N, H, H_out)

    # VMEM budget: double-buffered in/out/T/shift blocks + scratch, 4x headroom,
    # clamped so it also fits v7x's 64 MiB physical VMEM.
    est = (2 * (B * H * W * Cin * 2
                + KH * W * Cin * W_out * Cout * 2
                + W_out * Cout * 4
                + B * H_out * W_out * Cout * 2)
           + KH * B * H_out * W * Cin * 2)
    vmem_limit = int(min(64 * 2**20, max(4 * 2**20, 4 * est)))

    kernel = functools.partial(_conv_bn_lrelu_kernel,
                               B=B, H=H, H_out=H_out, KH=KH, pad=p)
    out_rows = pl.pallas_call(
        kernel,
        out_shape=jax.ShapeDtypeStruct((N * H_out, W_out * Cout), jnp.bfloat16),
        grid=(N // B,),
        in_specs=[
            pl.BlockSpec((B * H, W * Cin), lambda n: (n, 0)),
            pl.BlockSpec((KH, W * Cin, W_out * Cout), lambda n: (0, 0, 0)),
            pl.BlockSpec((1, W_out * Cout), lambda n: (0, 0)),
        ],
        out_specs=pl.BlockSpec((B * H_out, W_out * Cout), lambda n: (n, 0)),
        scratch_shapes=[pltpu.VMEM((KH, B * H_out, W * Cin), jnp.bfloat16)],
        compiler_params=pltpu.CompilerParams(
            dimension_semantics=("parallel",),
            vmem_limit_bytes=vmem_limit),
    )(x_rows, t, shift_row)

    out_nhwc = out_rows.reshape(N, H_out, W_out, Cout)
    return jnp.transpose(out_nhwc, (0, 3, 1, 2))


def _reference(x_nchw, weight_oihw, gamma, beta, running_mean, running_var,
               padding, eps=1e-5):
    # Mirrors the kernel's quantization (bf16 activations, bf16(weight*scale),
    # f32 accumulation); output kept in f32.
    scale = gamma / jnp.sqrt(running_var + eps)
    shift = beta - running_mean * scale
    xb = x_nchw.astype(jnp.bfloat16).astype(jnp.float32)
    wb = (weight_oihw * scale[:, None, None, None]
          ).astype(jnp.bfloat16).astype(jnp.float32)
    y = lax.conv_general_dilated(
        xb, wb, window_strides=(1, 1),
        padding=[(padding, padding), (padding, padding)],
        dimension_numbers=("NCHW", "OIHW", "NCHW"))
    y = y + shift.reshape(1, -1, 1, 1)
    return jnp.where(y > 0, y, 0.1 * y)


if __name__ == "__main__":
    # ConvBlock(in_channels=4, out_channels=8, kernel_size=3, padding=1)
    in_channels, out_channels, kernel_size, padding = 4, 8, 3, 1
    N, H, W = 2, 16, 16

    key = jax.random.PRNGKey(0)
    k_x, k_w, k_g, k_b, k_m, k_v = jax.random.split(key, 6)

    x = jax.random.normal(k_x, (N, in_channels, H, W), jnp.float32)
    weight = jax.random.normal(
        k_w, (out_channels, in_channels, kernel_size, kernel_size),
        jnp.float32) * 0.1
    gamma = 1.0 + 0.1 * jax.random.normal(k_g, (out_channels,), jnp.float32)
    beta = 0.1 * jax.random.normal(k_b, (out_channels,), jnp.float32)
    running_mean = 0.1 * jax.random.normal(k_m, (out_channels,), jnp.float32)
    running_var = jnp.abs(1.0 + 0.1 * jax.random.normal(
        k_v, (out_channels,), jnp.float32))

    out = conv_block_forward(x, weight, gamma, beta, running_mean, running_var,
                             padding=padding)
    out = jax.block_until_ready(out)

    ref = _reference(x, weight, gamma, beta, running_mean, running_var, padding)
    assert out.shape == (N, out_channels, H, W), out.shape
    # bf16 kernel output vs f32 reference: tolerance covers the final bf16
    # rounding of the output store.
    assert jnp.allclose(out.astype(jnp.float32), ref, atol=1e-2, rtol=1e-2), \
        "mismatch vs reference"

    print("KERNEL_OK")
</pallas_src>

<mosaic_0001>
module attributes {stable_mosaic.version = 11 : i64} {
  func.func @_conv_bn_lrelu_kernel(%arg0: i32, %arg1: memref<32x64xbf16, #tpu.memory_space<vmem>>, %arg2: memref<3x64x128xbf16, #tpu.memory_space<vmem>>, %arg3: memref<1x128xf32, #tpu.memory_space<vmem>>, %arg4: memref<32x128xbf16, #tpu.memory_space<vmem>>, %arg5: memref<3x32x64xbf16, #tpu.memory_space<vmem>>) attributes {dimension_semantics = [#tpu.dimension_semantics<parallel>], iteration_bounds = array<i64: 1>, scalar_prefetch = 0 : i64, scratch_operands = 1 : i64, tpu.core_type = #tpu.core_type<tc>, window_params = [{transform_indices = @transform_0, window_bounds = array<i64: 32, 64>}, {pipeline_mode = #tpu.pipeline_mode<synchronous>, transform_indices = @transform_1, window_bounds = array<i64: 3, 64, 128>}, {pipeline_mode = #tpu.pipeline_mode<synchronous>, transform_indices = @transform_2, window_bounds = array<i64: 1, 128>}, {transform_indices = @transform_3, window_bounds = array<i64: 32, 128>}]} {
    %cst = arith.constant 0.000000e+00 : bf16
    %0 = vector.broadcast %cst : bf16 to vector<1x64xbf16>
    %c0 = arith.constant 0 : index
    %c0_0 = arith.constant 0 : index
    %c0_1 = arith.constant 0 : index
    %1 = vector.load %arg5[%c0, %c0_0, %c0_1] : memref<3x32x64xbf16, #tpu.memory_space<vmem>>, vector<1x1x64xbf16>
    %2 = vector.shape_cast %1 : vector<1x1x64xbf16> to vector<1x64xbf16>
    %3 = vector.shape_cast %0 : vector<1x64xbf16> to vector<1x1x64xbf16>
    tpu.vector_store %arg5[%c0, %c0_0, %c0_1], %3 {strides = array<i32>} : memref<3x32x64xbf16, #tpu.memory_space<vmem>>, vector<1x1x64xbf16>,
    %c0_2 = arith.constant 0 : index
    %c0_3 = arith.constant 0 : index
    %4 = vector.load %arg1[%c0_2, %c0_3] : memref<32x64xbf16, #tpu.memory_space<vmem>>, vector<15x64xbf16>
    %c0_4 = arith.constant 0 : index
    %c1 = arith.constant 1 : index
    %c0_5 = arith.constant 0 : index
    %5 = vector.load %arg5[%c0_4, %c1, %c0_5] : memref<3x32x64xbf16, #tpu.memory_space<vmem>>, vector<1x15x64xbf16>
    %6 = vector.shape_cast %5 : vector<1x15x64xbf16> to vector<15x64xbf16>
    %7 = vector.shape_cast %4 : vector<15x64xbf16> to vector<1x15x64xbf16>
    tpu.vector_store %arg5[%c0_4, %c1, %c0_5], %7 {strides = array<i32>} : memref<3x32x64xbf16, #tpu.memory_space<vmem>>, vector<1x15x64xbf16>,
    %cst_6 = arith.constant 0.000000e+00 : bf16
    %8 = vector.broadcast %cst_6 : bf16 to vector<1x64xbf16>
    %c0_7 = arith.constant 0 : index
    %c16 = arith.constant 16 : index
    %c0_8 = arith.constant 0 : index
    %9 = vector.load %arg5[%c0_7, %c16, %c0_8] : memref<3x32x64xbf16, #tpu.memory_space<vmem>>, vector<1x1x64xbf16>
    %10 = vector.shape_cast %9 : vector<1x1x64xbf16> to vector<1x64xbf16>
    %11 = vector.shape_cast %8 : vector<1x64xbf16> to vector<1x1x64xbf16>
    tpu.vector_store %arg5[%c0_7, %c16, %c0_8], %11 {strides = array<i32>} : memref<3x32x64xbf16, #tpu.memory_space<vmem>>, vector<1x1x64xbf16>,
    %c16_9 = arith.constant 16 : index
    %c0_10 = arith.constant 0 : index
    %12 = vector.load %arg1[%c16_9, %c0_10] : memref<32x64xbf16, #tpu.memory_space<vmem>>, vector<15x64xbf16>
    %c0_11 = arith.constant 0 : index
    %c17 = arith.constant 17 : index
    %c0_12 = arith.constant 0 : index
    %13 = vector.load %arg5[%c0_11, %c17, %c0_12] : memref<3x32x64xbf16, #tpu.memory_space<vmem>>, vector<1x15x64xbf16>
    %14 = vector.shape_cast %13 : vector<1x15x64xbf16> to vector<15x64xbf16>
    %15 = vector.shape_cast %12 : vector<15x64xbf16> to vector<1x15x64xbf16>
    tpu.vector_store %arg5[%c0_11, %c17, %c0_12], %15 {strides = array<i32>} : memref<3x32x64xbf16, #tpu.memory_space<vmem>>, vector<1x15x64xbf16>,
    %c0_13 = arith.constant 0 : index
    %c0_14 = arith.constant 0 : index
    %16 = vector.load %arg1[%c0_13, %c0_14] : memref<32x64xbf16, #tpu.memory_space<vmem>>, vector<16x64xbf16>
    %c1_15 = arith.constant 1 : index
    %c0_16 = arith.constant 0 : index
    %c0_17 = arith.constant 0 : index
    %17 = vector.load %arg5[%c1_15, %c0_16, %c0_17] : memref<3x32x64xbf16, #tpu.memory_space<vmem>>, vector<1x16x64xbf16>
    %18 = vector.shape_cast %17 : vector<1x16x64xbf16> to vector<16x64xbf16>
    %19 = vector.shape_cast %16 : vector<16x64xbf16> to vector<1x16x64xbf16>
    tpu.vector_store %arg5[%c1_15, %c0_16, %c0_17], %19 {strides = array<i32>} : memref<3x32x64xbf16, #tpu.memory_space<vmem>>, vector<1x16x64xbf16>,
    %c16_18 = arith.constant 16 : index
    %c0_19 = arith.constant 0 : index
    %20 = vector.load %arg1[%c16_18, %c0_19] : memref<32x64xbf16, #tpu.memory_space<vmem>>, vector<16x64xbf16>
    %c1_20 = arith.constant 1 : index
    %c16_21 = arith.constant 16 : index
    %c0_22 = arith.constant 0 : index
    %21 = vector.load %arg5[%c1_20, %c16_21, %c0_22] : memref<3x32x64xbf16, #tpu.memory_space<vmem>>, vector<1x16x64xbf16>
    %22 = vector.shape_cast %21 : vector<1x16x64xbf16> to vector<16x64xbf16>
    %23 = vector.shape_cast %20 : vector<16x64xbf16> to vector<1x16x64xbf16>
    tpu.vector_store %arg5[%c1_20, %c16_21, %c0_22], %23 {strides = array<i32>} : memref<3x32x64xbf16, #tpu.memory_space<vmem>>, vector<1x16x64xbf16>,
    %cst_23 = arith.constant 0.000000e+00 : bf16
    %24 = vector.broadcast %cst_23 : bf16 to vector<1x64xbf16>
    %c2 = arith.constant 2 : index
    %c15 = arith.constant 15 : index
    %c0_24 = arith.constant 0 : index
    %25 = vector.load %arg5[%c2, %c15, %c0_24] : memref<3x32x64xbf16, #tpu.memory_space<vmem>>, vector<1x1x64xbf16>
    %26 = vector.shape_cast %25 : vector<1x1x64xbf16> to vector<1x64xbf16>
    %27 = vector.shape_cast %24 : vector<1x64xbf16> to vector<1x1x64xbf16>
    tpu.vector_store %arg5[%c2, %c15, %c0_24], %27 {strides = array<i32>} : memref<3x32x64xbf16, #tpu.memory_space<vmem>>, vector<1x1x64xbf16>,
    %c1_25 = arith.constant 1 : index
    %c0_26 = arith.constant 0 : index
    %28 = vector.load %arg1[%c1_25, %c0_26] : memref<32x64xbf16, #tpu.memory_space<vmem>>, vector<15x64xbf16>
    %c2_27 = arith.constant 2 : index
    %c0_28 = arith.constant 0 : index
    %c0_29 = arith.constant 0 : index
    %29 = vector.load %arg5[%c2_27, %c0_28, %c0_29] : memref<3x32x64xbf16, #tpu.memory_space<vmem>>, vector<1x15x64xbf16>
    %30 = vector.shape_cast %29 : vector<1x15x64xbf16> to vector<15x64xbf16>
    %31 = vector.shape_cast %28 : vector<15x64xbf16> to vector<1x15x64xbf16>
    tpu.vector_store %arg5[%c2_27, %c0_28, %c0_29], %31 {strides = array<i32>} : memref<3x32x64xbf16, #tpu.memory_space<vmem>>, vector<1x15x64xbf16>,
    %cst_30 = arith.constant 0.000000e+00 : bf16
    %32 = vector.broadcast %cst_30 : bf16 to vector<1x64xbf16>
    %c2_31 = arith.constant 2 : index
    %c31 = arith.constant 31 : index
    %c0_32 = arith.constant 0 : index
    %33 = vector.load %arg5[%c2_31, %c31, %c0_32] : memref<3x32x64xbf16, #tpu.memory_space<vmem>>, vector<1x1x64xbf16>
    %34 = vector.shape_cast %33 : vector<1x1x64xbf16> to vector<1x64xbf16>
    %35 = vector.shape_cast %32 : vector<1x64xbf16> to vector<1x1x64xbf16>
    tpu.vector_store %arg5[%c2_31, %c31, %c0_32], %35 {strides = array<i32>} : memref<3x32x64xbf16, #tpu.memory_space<vmem>>, vector<1x1x64xbf16>,
    %c17_33 = arith.constant 17 : index
    %c0_34 = arith.constant 0 : index
    %36 = vector.load %arg1[%c17_33, %c0_34] : memref<32x64xbf16, #tpu.memory_space<vmem>>, vector<15x64xbf16>
    %c2_35 = arith.constant 2 : index
    %c16_36 = arith.constant 16 : index
    %c0_37 = arith.constant 0 : index
    %37 = vector.load %arg5[%c2_35, %c16_36, %c0_37] : memref<3x32x64xbf16, #tpu.memory_space<vmem>>, vector<1x15x64xbf16>
    %38 = vector.shape_cast %37 : vector<1x15x64xbf16> to vector<15x64xbf16>
    %39 = vector.shape_cast %36 : vector<15x64xbf16> to vector<1x15x64xbf16>
    tpu.vector_store %arg5[%c2_35, %c16_36, %c0_37], %39 {strides = array<i32>} : memref<3x32x64xbf16, #tpu.memory_space<vmem>>, vector<1x15x64xbf16>,
    %c0_38 = arith.constant 0 : index
    %c0_39 = arith.constant 0 : index
    %c0_40 = arith.constant 0 : index
    %40 = vector.load %arg5[%c0_38, %c0_39, %c0_40] : memref<3x32x64xbf16, #tpu.memory_space<vmem>>, vector<1x32x64xbf16>
    %41 = vector.shape_cast %40 : vector<1x32x64xbf16> to vector<32x64xbf16>
    %c0_41 = arith.constant 0 : index
    %c0_42 = arith.constant 0 : index
    %c0_43 = arith.constant 0 : index
    %42 = vector.load %arg2[%c0_41, %c0_42, %c0_43] : memref<3x64x128xbf16, #tpu.memory_space<vmem>>, vector<1x64x128xbf16>
    %43 = vector.shape_cast %42 : vector<1x64x128xbf16> to vector<64x128xbf16>
    %cst_44 = arith.constant dense<0.000000e+00> : vector<32x128xf32>
    %44 = tpu.matmul %41, %43, %cst_44 {dimension_numbers = #tpu.dot_dimension_numbers<[1], [0], [0], [1], [0, 0, 1, 1], [], []>} : vector<32x64xbf16>, vector<64x128xbf16>, vector<32x128xf32> -> vector<32x128xf32>
    %c1_45 = arith.constant 1 : index
    %c0_46 = arith.constant 0 : index
    %c0_47 = arith.constant 0 : index
    %45 = vector.load %arg5[%c1_45, %c0_46, %c0_47] : memref<3x32x64xbf16, #tpu.memory_space<vmem>>, vector<1x32x64xbf16>
    %46 = vector.shape_cast %45 : vector<1x32x64xbf16> to vector<32x64xbf16>
    %c1_48 = arith.constant 1 : index
    %c0_49 = arith.constant 0 : index
    %c0_50 = arith.constant 0 : index
    %47 = vector.load %arg2[%c1_48, %c0_49, %c0_50] : memref<3x64x128xbf16, #tpu.memory_space<vmem>>, vector<1x64x128xbf16>
    %48 = vector.shape_cast %47 : vector<1x64x128xbf16> to vector<64x128xbf16>
    %cst_51 = arith.constant dense<0.000000e+00> : vector<32x128xf32>
    %49 = tpu.matmul %46, %48, %cst_51 {dimension_numbers = #tpu.dot_dimension_numbers<[1], [0], [0], [1], [0, 0, 1, 1], [], []>} : vector<32x64xbf16>, vector<64x128xbf16>, vector<32x128xf32> -> vector<32x128xf32>
    %50 = arith.addf %44, %49 : vector<32x128xf32>
    %c2_52 = arith.constant 2 : index
    %c0_53 = arith.constant 0 : index
    %c0_54 = arith.constant 0 : index
    %51 = vector.load %arg5[%c2_52, %c0_53, %c0_54] : memref<3x32x64xbf16, #tpu.memory_space<vmem>>, vector<1x32x64xbf16>
    %52 = vector.shape_cast %51 : vector<1x32x64xbf16> to vector<32x64xbf16>
    %c2_55 = arith.constant 2 : index
    %c0_56 = arith.constant 0 : index
    %c0_57 = arith.constant 0 : index
    %53 = vector.load %arg2[%c2_55, %c0_56, %c0_57] : memref<3x64x128xbf16, #tpu.memory_space<vmem>>, vector<1x64x128xbf16>
    %54 = vector.shape_cast %53 : vector<1x64x128xbf16> to vector<64x128xbf16>
    %cst_58 = arith.constant dense<0.000000e+00> : vector<32x128xf32>
    %55 = tpu.matmul %52, %54, %cst_58 {dimension_numbers = #tpu.dot_dimension_numbers<[1], [0], [0], [1], [0, 0, 1, 1], [], []>} : vector<32x64xbf16>, vector<64x128xbf16>, vector<32x128xf32> -> vector<32x128xf32>
    %56 = arith.addf %50, %55 : vector<32x128xf32>
    %c0_59 = arith.constant 0 : index
    %c0_60 = arith.constant 0 : index
    %57 = vector.load %arg3[%c0_59, %c0_60] : memref<1x128xf32, #tpu.memory_space<vmem>>, vector<1x128xf32>
    %58 = vector.broadcast %57 : vector<1x128xf32> to vector<32x128xf32>
    %59 = arith.addf %56, %58 : vector<32x128xf32>
    %cst_61 = arith.constant 0.000000e+00 : f32
    %60 = vector.broadcast %cst_61 : f32 to vector<32x128xf32>
    %61 = arith.cmpf ogt, %59, %60 : vector<32x128xf32>
    %cst_62 = arith.constant 1.000000e-01 : f32
    %62 = vector.broadcast %cst_62 : f32 to vector<32x128xf32>
    %63 = arith.mulf %62, %59 : vector<32x128xf32>
    %64 = arith.select %61, %59, %63 : vector<32x128xi1>, vector<32x128xf32>
    %65 = arith.truncf %64 : vector<32x128xf32> to vector<32x128xbf16>
    %c0_63 = arith.constant 0 : index
    %c0_64 = arith.constant 0 : index
    %66 = vector.load %arg4[%c0_63, %c0_64] : memref<32x128xbf16, #tpu.memory_space<vmem>>, vector<32x128xbf16>
    tpu.vector_store %arg4[%c0_63, %c0_64], %65 {strides = array<i32>} : memref<32x128xbf16, #tpu.memory_space<vmem>>, vector<32x128xbf16>,
    return
  }
  func.func @transform_0(%arg0: i32) -> (i32, i32) {
    %c0_i32 = arith.constant 0 : i32
    %c0_i32_0 = arith.constant 0 : i32
    return %arg0, %c0_i32 : i32, i32
  }
  func.func @transform_1(%arg0: i32) -> (i32, i32, i32) {
    %c0_i32 = arith.constant 0 : i32
    %c0_i32_0 = arith.constant 0 : i32
    %c0_i32_1 = arith.constant 0 : i32
    %c0_i32_2 = arith.constant 0 : i32
    return %c0_i32, %c0_i32_0, %c0_i32_1 : i32, i32, i32
  }
  func.func @transform_2(%arg0: i32) -> (i32, i32) {
    %c0_i32 = arith.constant 0 : i32
    %c0_i32_0 = arith.constant 0 : i32
    %c0_i32_1 = arith.constant 0 : i32
    return %c0_i32, %c0_i32_0 : i32, i32
  }
  func.func @transform_3(%arg0: i32) -> (i32, i32) {
    %c0_i32 = arith.constant 0 : i32
    %c0_i32_0 = arith.constant 0 : i32
    return %arg0, %c0_i32 : i32, i32
  }
}

</mosaic_0001>

<bundles_post_ra>
// kernel: tile.8
= control target key start
LH: loop header
LB: loop body
LE: loop exit
PB: predicated region body
PF: predicated region fallthrough
CT: control target
= control target key end

     0   :  { %s28_s0 = inlined_call_operand.vmem [shape: f32[8], index: 0, kind: input, shape index: {}]   ;;  %s29_s1 = inlined_call_operand.vmem [shape: f32[16,8], index: 1, kind: output, shape index: {}]  }
   0x1   :  { %v4_v0 = vld [vmem:[%s28_s0] ss:$0 sm:$0xff] }
   0x2   :  { %5 = vst [vmem:[%s29_s1] sm:$0xff] %v4_v0  ;;  %8 = vst [vmem:[%s29_s1 + $0x8] sm:$0xff] %v4_v0 }

// kernel: tile.9
= control target key start
LH: loop header
LB: loop body
LE: loop exit
PB: predicated region body
PF: predicated region fallthrough
CT: control target
= control target key end

     0   :  { %s131_s10 = smov 120   ;;  %s132_s11 = smov 104   ;;  %vm3_vm0 = vcmask 64512   ;;  %vm9_vm1 = vcmask 1048512   ;;  %vm15_vm2 = vcmask 982912   ;;  %vm21_vm3 = vcmask 917312   ;;  %s207_s0 = inlined_call_operand.vmem [shape: f32[16,8], index: 0, kind: input, shape index: {}]   ;;  %s208_s1 = inlined_call_operand.vmem [shape: f32[1,128], index: 1, kind: output, shape index: {}]  }
   0x1   :  { %v101_v0 = vld [vmem:[%s207_s0 + $0xf] sm:$0x1]   ;;  %v103_v1 = vld [vmem:[%s207_s0 + $0xd] sm:$0x1]   ;;  %v102_v2 = vld [vmem:[%s207_s0 + $0xe] sm:$0x1]  }
   0x2   :  { %7 = vrot.lane.b32.xlu0 %v101_v0, %s131_s10  ;;  %19 = vrot.lane.b32.xlu1 %v103_v1, %s132_s11  ;;  %v104_v3 = vld [vmem:[%s207_s0 + $0xc] sm:$0x1]   ;;  %s133_s16 = smov 112   ;;  %s134_s17 = smov 96   ;;  %v105_v4 = vld [vmem:[%s207_s0 + $0xb] sm:$0x1]  }
   0x3   :  { %v106_v5 = vld [vmem:[%s207_s0 + $0xa] sm:$0x1]   ;;  %v2_v6 = vld [vmem:[%s207_s0] sm:$0x1]   ;;  %s135_s24 = smov 88   ;;  %s136_s25 = smov 80  }
   0x4   :  { %4 = vst.msk [vmem:[#allocation0] sm:$0x1] %vm3_vm0, %v2_v6   ;;  %v107_v7 = vld [vmem:[%s207_s0 + $0x9] sm:$0x1]   ;;  %v108_v8 = vld [vmem:[%s207_s0 + $0x8] sm:$0x1]  }
   0x5   :  { %s137_s30 = smov 72   ;;  %s138_s2 = smov 64   ;;  %v109_v9 = vld [vmem:[%s207_s0 + $0x7] sm:$0x1]   ;;  %v110_v10 = vld [vmem:[%s207_s0 + $0x6] sm:$0x1]  }
   0x6   :  { %13 = vrot.lane.b32.xlu0 %v102_v2, %s133_s16  ;;  %25 = vrot.lane.b32.xlu1 %v104_v3, %s134_s17  ;;  %s139_s7 = smov 56   ;;  %s140_s8 = smov 48   ;;  %v111_v11 = vld [vmem:[%s207_s0 + $0x5] sm:$0x1]   ;;  %v112_v12 = vld [vmem:[%s207_s0 + $0x4] sm:$0x1]  }
   0x7   :  { %s141_s13 = smov 40   ;;  %s142_s14 = smov 32   ;;  %v113_v13 = vld [vmem:[%s207_s0 + $0x3] sm:$0x1]   ;;  %v114_v14 = vld [vmem:[%s207_s0 + $0x2] sm:$0x1]  }
   0x8   :  { %s143_s19 = smov 24   ;;  %s144_s20 = smov 16   ;;  %v115_v15 = vld [vmem:[%s207_s0 + $0x1] sm:$0x1]   ;;  %vm27_vm4 = vcmask 851712   ;;  %vm33_vm5 = vcmask 786112  }
   0x9   :  { %s145_s0 = smov 8   ;;  %vm39_vm6 = vcmask 720512   ;;  %vm45_vm7 = vcmask 654912   ;;  %vm51_vm8 = vcmask 589312   ;;  %vm57_vm9 = vcmask 523712  }
   0xa   :  { %31 = vrot.lane.b32.xlu0 %v105_v4, %s135_s24  ;;  %37 = vrot.lane.b32.xlu1 %v106_v5, %s136_s25  ;;  %vm63_vm10 = vcmask 458112   ;;  %vm69_vm11 = vcmask 392512   ;;  %vm75_vm12 = vcmask 326912   ;;  %vm81_vm13 = vcmask 261312  }
   0xb   :  { %vm87_vm14 = vcmask 195712   ;;  %vm93_vm15 = vcmask 130112  }
   0xe   :  { %43 = vrot.lane.b32.xlu0 %v107_v7, %s137_s30  ;;  %49 = vrot.lane.b32.xlu1 %v108_v8, %s138_s2 }
  0x12   :  { %55 = vrot.lane.b32.xlu0 %v109_v9, %s139_s7  ;;  %61 = vrot.lane.b32.xlu1 %v110_v10, %s140_s8 }
  0x16   :  { %67 = vrot.lane.b32.xlu0 %v111_v11, %s141_s13  ;;  %73 = vrot.lane.b32.xlu1 %v112_v12, %s142_s14 }
  0x1a   :  { %79 = vrot.lane.b32.xlu0 %v113_v13, %s143_s19  ;;  %85 = vrot.lane.b32.xlu1 %v114_v14, %s144_s20 }
  0x1e   :  { %91 = vrot.lane.b32.xlu0 %v115_v15, %s145_s0 }
  0x74   :  { %v8_v16 = vpop.permute.xlu0 %7   ;;  %v20_v17 = vpop.permute.xlu1 %19  }
  0x75   :  { %10 = vst.msk [vmem:[#allocation0] sm:$0x1] %vm9_vm1, %v8_v16  }
  0x78   :  { %v14_v18 = vpop.permute.xlu0 %13   ;;  %v26_v19 = vpop.permute.xlu1 %25  }
  0x79   :  { %16 = vst.msk [vmem:[#allocation0] sm:$0x1] %vm15_vm2, %v14_v18  }
  0x7a   :  { %22 = vst.msk [vmem:[#allocation0] sm:$0x1] %vm21_vm3, %v20_v17  }
  0x7b   :  { %28 = vst.msk [vmem:[#allocation0] sm:$0x1] %vm27_vm4, %v26_v19  }
  0x7c   :  { %v32_v20 = vpop.permute.xlu0 %31   ;;  %v38_v21 = vpop.permute.xlu1 %37  }
  0x7d   :  { %34 = vst.msk [vmem:[#allocation0] sm:$0x1] %vm33_vm5, %v32_v20  }
  0x7e   :  { %40 = vst.msk [vmem:[#allocation0] sm:$0x1] %vm39_vm6, %v38_v21  }
  0x80   :  { %v44_v22 = vpop.permute.xlu0 %43   ;;  %v50_v23 = vpop.permute.xlu1 %49  }
  0x81   :  { %46 = vst.msk [vmem:[#allocation0] sm:$0x1] %vm45_vm7, %v44_v22  }
  0x82   :  { %52 = vst.msk [vmem:[#allocation0] sm:$0x1] %vm51_vm8, %v50_v23  }
  0x84   :  { %v56_v24 = vpop.permute.xlu0 %55   ;;  %v62_v25 = vpop.permute.xlu1 %61  }
  0x85   :  { %58 = vst.msk [vmem:[#allocation0] sm:$0x1] %vm57_vm9, %v56_v24  }
  0x86   :  { %64 = vst.msk [vmem:[#allocation0] sm:$0x1] %vm63_vm10, %v62_v25  }
  0x88   :  { %v68_v26 = vpop.permute.xlu0 %67   ;;  %v74_v27 = vpop.permute.xlu1 %73  }
  0x89   :  { %70 = vst.msk [vmem:[#allocation0] sm:$0x1] %vm69_vm11, %v68_v26  }
  0x8a   :  { %76 = vst.msk [vmem:[#allocation0] sm:$0x1] %vm75_vm12, %v74_v27  }
  0x8c   :  { %v80_v28 = vpop.permute.xlu0 %79   ;;  %v86_v29 = vpop.permute.xlu1 %85  }
  0x8d   :  { %82 = vst.msk [vmem:[#allocation0] sm:$0x1] %vm81_vm13, %v80_v28  }
  0x8e   :  { %88 = vst.msk [vmem:[#allocation0] sm:$0x1] %vm87_vm14, %v86_v29  }
  0x90   :  { %v92_v30 = vpop.permute.xlu0 %91  }
  0x91   :  { %94 = vst.msk [vmem:[#allocation0] sm:$0x1] %vm93_vm15, %v92_v30  }
  0x98   :  { %v98_v31 = vld [vmem:[#allocation0] sm:$0x1] }
  0x99   :  { %100 = vst [vmem:[%s208_s1] sm:$0x1] %v98_v31 }

// kernel: conv_block_forward.1
= control target key start
LH: loop header
LB: loop body
LE: loop exit
PB: predicated region body
PF: predicated region fallthrough
CT: control target
= control target key end

     0   :  { %vm16_vm0 = vsmask.f32 256  ;;  %vm15_vm1 = vcmask 516096   ;;  %v18_v2 = vld [vmem:[#allocation2] sm:$0x1]  ;;  %vm36_vm2 = vcmask 523264   ;;  %s709_s1 = inlined_call_operand.vmem [shape: bf16[3,64,128], index: 1, kind: input, shape index: {}]   ;;  %s710_s0 = inlined_call_operand.vmem [shape: bf16[32,64], index: 0, kind: input, shape index: {}]   ;;  %s711_s2 = inlined_call_operand.vmem [shape: f32[1,128], index: 2, kind: input, shape index: {}]   ;;  %s712_s3 = inlined_call_operand.vmem [shape: bf16[32,128], index: 3, kind: output, shape index: {}]  }
   0x1   :  { %v573_v0 = vld [vmem:[%s709_s1] sm:$0xff]   ;;  %v574_v1 = vld [vmem:[%s709_s1 + $0x8] sm:$0xff]   ;;  %v575_v3 = vld [vmem:[%s709_s1 + $0x10] sm:$0xff]   ;;  %vm37_vm4 = vsmask.f32 7938  ;;  %vm84_vm7 = vcmask 523271  }
   0x2   :  { %541 = vmatprep.subr.bf16.mxu0 %v573_v0  ;;  %v577_v4 = vld [vmem:[%s709_s1 + $0x20] sm:$0xff]   ;;  %vm623_vm3 = vmand %vm15_vm1, %vm16_vm0  ;;  %v42_v8 = vld [vmem:[#allocation2 + $0x8] sm:$0x1]  ;;  %vm85_vm5 = vsmask.f32 7966 }
   0x3   :  { %542 = vmatpush3.bf16.msra.mxu0 %v573_v0  ;;  %529 = vmatprep.subr.bf16.mxu1 %v577_v4  ;;  %v19_v6 = vsel %vm623_vm3, 0, %v18_v2  ;;  %v578_v7 = vld [vmem:[%s710_s0] sm:$0xff]   ;;  %v576_v9 = vld [vmem:[%s709_s1 + $0x18] sm:$0xff]   ;;  %v43_v10 = vsel %vm623_vm3, 0, %v42_v8  ;;  %vm638_vm6 = vmand %vm36_vm2, %vm37_vm4  ;;  %vm105_vm9 = vsmask.f32 7424 }
   0x4   :  { %543 = vmatprep.subr.bf16.mxu0 %v574_v1  ;;  %530 = vmatpush3.bf16.msra.mxu1 %v577_v4  ;;  %20 = vst [vmem:[#allocation2] sm:$0x1] %v19_v6  ;;  %v29_v11 = vshrl.u32 %v578_v7, 16  ;;  %v32_v12 = vshll.u32 %v578_v7, 16  ;;  %44 = vst [vmem:[#allocation2 + $0x8] sm:$0x1] %v43_v10 }
   0x5   :  { %v580_v14 = vld [vmem:[%s709_s1 + $0x28] sm:$0xff]   ;;  %v579_v17 = vld [vmem:[%s709_s1 + $0x40] sm:$0xff]   ;;  %v583_v21 = vld [vmem:[%s709_s1 + $0x30] sm:$0xff]  }
   0x6   :  { %v31_v15 = vrot.slane %v29_v11, 7  ;;  %v581_v16 = vld [vmem:[%s710_s0 + $0x8] sm:$0xff]   ;;  %531 = vmatprep.subr.bf16.mxu1 %v580_v14  ;;  %vm655_vm8 = vmand %vm84_vm7, %vm85_vm5  ;;  %v585_v25 = vld [vmem:[%s709_s1 + $0x38] sm:$0xff]  }
   0x7   :  { %544 = vmatpush3.bf16.msra.mxu0 %v574_v1  ;;  %v53_v19 = vshrl.u32 %v581_v16, 16  ;;  %v56_v20 = vshll.u32 %v581_v16, 16  ;;  %v586_v28 = vld [vmem:[%s710_s0] sm:$0xff]   ;;  %v582_v30 = vld [vmem:[%s709_s1 + $0x48] sm:$0xff]   ;;  %v584_v39 = vld [vmem:[%s709_s1 + $0x50] sm:$0xff]  }
   0x8   :  { %545 = vmatprep.subr.bf16.mxu0 %v575_v3  ;;  %v34_v18 = vor.u32 %v32_v12, %v31_v15  ;;  %532 = vmatpush3.bf16.msra.mxu1 %v580_v14  ;;  %73 = vst.msk [vmem:[#allocation2 + $0x10] sm:$0xff] %vm36_vm2, %v586_v28  ;;  %v588_v31 = vld [vmem:[%s710_s0 + $0x8] sm:$0xff]   ;;  %v87_v33 = vld [vmem:[#allocation2 + $0x20] sm:$0x80]  ;;  %v587_v47 = vld [vmem:[%s709_s1 + $0x58] sm:$0xff]  }
   0x9   :  { %v55_v24 = vrot.slane %v53_v19, 7  ;;  %533 = vmatprep.subr.bf16.mxu1 %v583_v21  ;;  %82 = vst.msk [vmem:[#allocation2 + $0x18] sm:$0xff] %vm36_vm2, %v588_v31  ;;  %v88_v34 = vsel %vm655_vm8, 0, %v87_v33  ;;  %v589_v35 = vld [vmem:[%s710_s0] sm:$0xff]   ;;  %v110_v36 = vld [vmem:[#allocation2 + $0x28] sm:$0x80]  ;;  %vm106_vm10 = vmand %vm36_vm2, %vm105_vm9 }
   0xa   :  { %89 = vst [vmem:[#allocation2 + $0x20] sm:$0x80] %v88_v34  ;;  %v111_v37 = vsel %vm655_vm8, 0, %v110_v36  ;;  %v590_v38 = vld [vmem:[%s710_s0 + $0x8] sm:$0xff]   ;;  %v98_v40 = vshrl.u32 %v589_v35, 16  ;;  %v100_v41 = vshll.u32 %v589_v35, 16 }
   0xb   :  { %546 = vmatpush3.bf16.msra.mxu0 %v575_v3  ;;  %v39_v23 = vld [vmem:[#allocation2] sm:$0xff]  ;;  %v60_v27 = vld [vmem:[#allocation2 + $0x8] sm:$0xff]  ;;  %v58_v29 = vor.u32 %v56_v20, %v55_v24  ;;  %112 = vst [vmem:[#allocation2 + $0x28] sm:$0x80] %v111_v37  ;;  %v121_v42 = vshrl.u32 %v590_v38, 16  ;;  %v123_v43 = vshll.u32 %v590_v38, 16 }
   0xc   :  { %547 = vmatprep.subr.bf16.mxu0 %v576_v9  ;;  %v40_v26 = vsel %vm638_vm6, %v34_v18, %v39_v23  ;;  %534 = vmatpush3.bf16.msra.mxu1 %v583_v21  ;;  %v102_v44 = vrot.slane %v100_v41, 1  ;;  %v491_v60 = vld [vmem:[%s711_s2] ss:$0 sm:$0xff] }
   0xd   :  { %41 = vst [vmem:[#allocation2] sm:$0xff] %v40_v26  ;;  %549 = vmatprep.mubr.msk.bf16.mxu0 %vm36_vm2, %v40_v26  ;;  %v61_v32 = vsel %vm638_vm6, %v58_v29, %v60_v27  ;;  %535 = vmatprep.subr.bf16.mxu1 %v585_v25  ;;  %v125_v46 = vrot.slane %v123_v43, 1 }
   0xe   :  { %62 = vst [vmem:[#allocation2 + $0x8] sm:$0xff] %v61_v32  ;;  %v103_v48 = vor.u32 %v102_v44, %v98_v40 }
   0xf   :  { %548 = vmatpush3.bf16.msra.mxu0 %v576_v9  ;;  %v141_v45 = vld [vmem:[#allocation2 + $0x10] sm:$0xff]  ;;  %v126_v50 = vor.u32 %v125_v46, %v121_v42 }
  0x10   :  { %553 = vmatprep.subr.bf16.mxu0 %v579_v17  ;;  %536 = vmatpush3.bf16.msra.mxu1 %v585_v25  ;;  %v142_v49 = vld [vmem:[#allocation2 + $0x18] sm:$0xff] }
  0x11   :  { %537 = vmatprep.mubr.msk.bf16.mxu1 %vm36_vm2, %v141_v45  ;;  %v107_v51 = vld [vmem:[#allocation2 + $0x20] sm:$0xff] }
  0x12   :  { %550 = vmatmul.mubr.msk.bf16.vlgmr.msra.gmra.mrb[0].mxu0 %vm36_vm2, %v61_v32  ;;  %v108_v52 = vsel %vm106_vm10, %v103_v48, %v107_v51  ;;  %v128_v53 = vld [vmem:[#allocation2 + $0x28] sm:$0xff] }
  0x13   :  { %554 = vmatpush3.bf16.msra.mxu0 %v579_v17  ;;  %538 = vmatmul.mubr.msk.bf16.vlgmr.msra.gmra.mrb[0].mxu1 %vm36_vm2, %v142_v49  ;;  %109 = vst [vmem:[#allocation2 + $0x20] sm:$0xff] %v108_v52  ;;  %v129_v54 = vsel %vm106_vm10, %v126_v50, %v128_v53 }
  0x14   :  { %555 = vmatprep.subr.bf16.mxu0 %v582_v30  ;;  %561 = vmatprep.mubr.msk.bf16.mxu0 %vm36_vm2, %v108_v52  ;;  %130 = vst [vmem:[#allocation2 + $0x28] sm:$0xff] %v129_v54 }
  0x17   :  { %556 = vmatpush3.bf16.msra.mxu0 %v582_v30 }
  0x18   :  { %557 = vmatprep.subr.bf16.mxu0 %v584_v39 }
  0x1b   :  { %558 = vmatpush3.bf16.msra.mxu0 %v584_v39 }
  0x1c   :  { %559 = vmatprep.subr.bf16.mxu0 %v587_v47 }
  0x1f   :  { %560 = vmatpush3.bf16.msra.mxu0 %v587_v47 }
  0x22   :  { %562 = vmatmul.mubr.msk.bf16.vlgmr.msra.gmra.mrb[0].mxu0 %vm36_vm2, %v129_v54 }
  0xe6   :  { %v539_v55 = vpop.f32.mrb[0].mxu1 }
  0xe7   :  { %v216_v56 = vpop.f32.mrb[1].mxu1 }
  0xe8   :  { %v540_v57 = vpop.f32.mrb[2].mxu1 }
  0xe9   :  { %v219_v58 = vpop.f32.mrb[3].mxu1 }
  0xf5   :  { %v563_v59 = vpop.f32.mrb[0].mxu0 }
  0xf6   :  { %v565_v61 = vadd.f32 %v563_v59, %v539_v55  ;;  %v385_v62 = vpop.f32.mrb[1].mxu0 }
  0xf7   :  { %v566_v63 = vadd.f32 %v385_v62, %v216_v56  ;;  %v564_v0 = vpop.f32.mrb[2].mxu0 }
  0xf8   :  { %v413_v1 = vadd.f32 %v565_v61, %v491_v60  ;;  %v567_v2 = vadd.f32 %v564_v0, %v540_v57  ;;  %v388_v3 = vpop.f32.mrb[3].mxu0 }
  0xf9   :  { %v411_v4 = vadd.f32 %v566_v63, %v491_v60  ;;  %v568_v5 = vadd.f32 %v388_v3, %v219_v58 }
  0xfa   :  { %v421_v6 = vmul.f32 0.1, %v413_v1  ;;  %v414_v7 = vadd.f32 %v567_v2, %v491_v60  ;;  %vm417_vm11 = vcmp.gt.f32.partialorder %v413_v1, 0.0 }
  0xfb   :  { %v419_v8 = vmul.f32 0.1, %v411_v4  ;;  %v412_v9 = vadd.f32 %v568_v5, %v491_v60  ;;  %vm415_vm12 = vcmp.gt.f32.partialorder %v411_v4, 0.0 }
  0xfc   :  { %vm418_vm13 = vcmp.gt.f32.partialorder %v414_v7, 0.0  ;;  %v422_v10 = vmul.f32 0.1, %v414_v7  ;;  %v425_v12 = vsel %vm417_vm11, %v413_v1, %v421_v6 }
  0xfd   :  { %vm416_vm14 = vcmp.gt.f32.partialorder %v412_v9, 0.0  ;;  %v420_v11 = vmul.f32 0.1, %v412_v9  ;;  %v423_v14 = vsel %vm415_vm12, %v411_v4, %v419_v8 }
  0xfe   :  { %v426_v13 = vsel %vm418_vm13, %v414_v7, %v422_v10 }
  0xff   :  { %v508_v15 = vpack.c.bf16 %v426_v13, %v425_v12  ;;  %v424_v16 = vsel %vm416_vm14, %v412_v9, %v420_v11 }
 0x100   :  { %v503_v17 = vpack.c.bf16 %v424_v16, %v423_v14 }
 0x101   :  { %510 = vst [vmem:[%s712_s3 + $0x8] sm:$0xff] %v508_v15  }
 0x102   :  { %504 = vst [vmem:[%s712_s3] sm:$0xff] %v503_v17  }

</bundles_post_ra>
